<compile_context>
chip_gen: v7x
topology: tpu7x:2x2x1
jax: 0.10.0
libtpu: 0.0.40
codegen_flags: <defaults>
</compile_context>

<pallas_src>
import functools

import jax
import jax.numpy as jnp
from jax.experimental import pallas as pl
from jax.experimental.pallas import tpu as pltpu

BN_EPS = 1e-5


# ----------------------------------------------------------------------------
# Plain-JAX glue (sequential / sort / gather — no clean MXU mapping).
# ----------------------------------------------------------------------------
def farthest_point_sample(xyz, npoint):
    """xyz: (B, N, 3) -> (B, npoint) int32 indices."""
    B, N, _ = xyz.shape

    def body(i, state):
        centroids, distance, farthest = state
        centroids = centroids.at[:, i].set(farthest)
        centroid = jnp.take_along_axis(
            xyz, jnp.broadcast_to(farthest[:, None, None], (B, 1, 3)), axis=1)
        dist = jnp.sum((xyz - centroid) ** 2, axis=-1)
        distance = jnp.minimum(distance, dist)
        farthest = jnp.argmax(distance, axis=-1).astype(jnp.int32)
        return centroids, distance, farthest

    centroids = jnp.zeros((B, npoint), dtype=jnp.int32)
    distance = jnp.full((B, N), 1e10, dtype=xyz.dtype)
    # TODO(synk): PyTorch seeds FPS with torch.randint; use a deterministic start.
    farthest = jnp.zeros((B,), dtype=jnp.int32)
    centroids, _, _ = jax.lax.fori_loop(0, npoint, body,
                                        (centroids, distance, farthest))
    return centroids


def index_points(points, idx):
    """points: (B, N, C); idx: (B, ...) int -> (B, ..., C)."""
    B = idx.shape[0]
    C = points.shape[-1]
    flat = idx.reshape(B, -1)
    gidx = jnp.broadcast_to(flat[..., None], (B, flat.shape[1], C))
    return jnp.take_along_axis(points, gidx, axis=1).reshape(*idx.shape, C)


def square_distance(src, dst):
    """src: (B, S, C); dst: (B, N, C) -> (B, S, N)."""
    return jnp.sum((src[:, :, None, :] - dst[:, None, :, :]) ** 2, axis=-1)


# ----------------------------------------------------------------------------
# Pallas kernel: fused (matmul + bias + relu)^L  followed by max over the
# K-neighbour axis.  One (batch, S-tile) block per grid step.
# ----------------------------------------------------------------------------
def _make_mlp_max_kernel(num_layers, tile_s, k):
    def kernel(*refs):
        x_ref = refs[0]                                   # (1, tile_s*k, C_in)
        out_ref = refs[1 + 2 * num_layers]                # (1, tile_s, C_out)
        h = x_ref[0]                                      # (tile_s*k, C_in)
        for l in range(num_layers):
            w = refs[1 + 2 * l][...]                      # (C_l, C_{l+1})
            b = refs[2 + 2 * l][...]                      # (1, C_{l+1})
            h = jnp.dot(h, w, preferred_element_type=jnp.float32)
            h = jnp.maximum(h + b, 0.0)                   # BN folded into w/b
        c_out = h.shape[-1]
        h = h.reshape(tile_s, k, c_out)                   # split sublane groups
        out_ref[0] = jnp.max(h, axis=1).astype(out_ref.dtype)
    return kernel


def grouped_mlp_max(grouped, weights, biases):
    """grouped: (B, S, K, C_in); weights[l]: (C_l, C_{l+1}); biases[l]: (C_{l+1},).

    Returns max_K( relu(...relu(grouped @ W0 + b0)... @ WL + bL) ) -> (B, S, C_out).
    """
    B, S, K, C_in = grouped.shape
    num_layers = len(weights)
    C_out = weights[-1].shape[-1]

    # Tile the sampled-point axis so large point clouds stay within VMEM /
    # the vreg file (important for v7x's smaller 64 MiB VMEM).
    tile_s = S
    if S > 512:
        for t in (512, 256, 128, 64, 32, 16, 8):
            if S % t == 0:
                tile_s = t
                break
    n_s_tiles = S // tile_s

    x2 = grouped.reshape(B, S * K, C_in)                  # rows are s-major, k-minor

    in_specs = [pl.BlockSpec((1, tile_s * K, C_in), lambda b, s: (b, s, 0))]
    args = [x2]
    for w, bvec in zip(weights, biases):
        ci, co = w.shape
        in_specs.append(pl.BlockSpec((ci, co), lambda b, s: (0, 0)))
        in_specs.append(pl.BlockSpec((1, co), lambda b, s: (0, 0)))
        args.append(w.astype(jnp.float32))
        args.append(bvec.reshape(1, co).astype(jnp.float32))

    kernel = _make_mlp_max_kernel(num_layers, tile_s, K)
    return pl.pallas_call(
        kernel,
        out_shape=jax.ShapeDtypeStruct((B, S, C_out), grouped.dtype),
        grid_spec=pltpu.PrefetchScalarGridSpec(
            num_scalar_prefetch=0,
            grid=(B, n_s_tiles),
            in_specs=in_specs,
            out_specs=pl.BlockSpec((1, tile_s, C_out), lambda b, s: (b, s, 0)),
        ),
        compiler_params=pltpu.CompilerParams(
            dimension_semantics=("parallel", "parallel")),
    )(*args)


# ----------------------------------------------------------------------------
# TransitionDown.forward
# ----------------------------------------------------------------------------
def transition_down_forward(xyz, points, layer_params, npoint, nsample):
    """xyz: (B, N, 3); points: (B, N, D).

    layer_params: list of dicts with keys
        w (C_in, C_out)  -- PyTorch Conv2d weight is (C_out, C_in, 1, 1);
                            here stored as w_torch[:, :, 0, 0].T
        b, gamma, beta, mean, var (C_out,)  -- conv bias + BatchNorm2d (eval).
    Returns (new_xyz (B, npoint, 3), new_points (B, npoint, C_out)).
    """
    fps_idx = farthest_point_sample(xyz, npoint)
    new_xyz = index_points(xyz, fps_idx)                         # (B, S, 3)
    dists = square_distance(new_xyz, xyz)                        # (B, S, N)
    idx = jnp.argsort(dists, axis=-1)[:, :, :nsample]            # (B, S, K) kNN
    grouped_xyz = index_points(xyz, idx)                         # (B, S, K, 3)
    grouped_xyz_norm = grouped_xyz - new_xyz[:, :, None, :]
    grouped_points = index_points(points, idx)                   # (B, S, K, D)
    grouped = jnp.concatenate([grouped_xyz_norm, grouped_points], axis=-1)

    # Fold eval-mode BatchNorm2d into the 1x1 conv weight/bias.
    # TODO(synk): training-mode BN (batch statistics) is not modelled here.
    ws, bs = [], []
    for p in layer_params:
        scale = p["gamma"] * jax.lax.rsqrt(p["var"] + BN_EPS)
        ws.append(p["w"] * scale[None, :])
        bs.append((p["b"] - p["mean"]) * scale + p["beta"])

    new_points = grouped_mlp_max(grouped, ws, bs)
    return new_xyz, new_points


# ----------------------------------------------------------------------------
# Pure-JAX reference (same glue, einsum MLP) for correctness checking.
# ----------------------------------------------------------------------------
def _reference_forward(xyz, points, layer_params, npoint, nsample):
    fps_idx = farthest_point_sample(xyz, npoint)
    new_xyz = index_points(xyz, fps_idx)
    dists = square_distance(new_xyz, xyz)
    idx = jnp.argsort(dists, axis=-1)[:, :, :nsample]
    grouped_xyz = index_points(xyz, idx)
    grouped = jnp.concatenate(
        [grouped_xyz - new_xyz[:, :, None, :], index_points(points, idx)], axis=-1)
    h = grouped
    for p in layer_params:
        scale = p["gamma"] * jax.lax.rsqrt(p["var"] + BN_EPS)
        w = p["w"] * scale[None, :]
        b = (p["b"] - p["mean"]) * scale + p["beta"]
        h = jnp.maximum(jnp.einsum("bskc,co->bsko", h, w) + b, 0.0)
    return new_xyz, jnp.max(h, axis=2)


if __name__ == "__main__":
    B, N = 2, 64
    D = 29                        # point feature dim; in_channel = D + 3 = 32
    NPOINT = 16                   # k (number of down-sampled points)
    NSAMPLE = 8                   # nneighbor
    CHANNELS = [32, 64, 128]      # [in_channel, *mlp]  (lane-dense 128-ch output)

    key = jax.random.PRNGKey(0)
    kxyz, kpts, kparam = jax.random.split(key, 3)

    xyz = jax.random.normal(kxyz, (B, N, 3), jnp.float32)
    points = jax.random.normal(kpts, (B, N, D), jnp.float32)

    layer_params = []
    last = CHANNELS[0]
    pk = kparam
    for co in CHANNELS[1:]:
        pk, k_w, k_b, k_g, k_be, k_m, k_v = jax.random.split(pk, 7)
        bound = 1.0 / jnp.sqrt(last)
        layer_params.append(dict(
            w=jax.random.uniform(k_w, (last, co), jnp.float32, -bound, bound),
            b=jax.random.uniform(k_b, (co,), jnp.float32, -bound, bound),
            gamma=jax.random.uniform(k_g, (co,), jnp.float32, 0.5, 1.5),
            beta=jax.random.uniform(k_be, (co,), jnp.float32, -0.5, 0.5),
            mean=0.1 * jax.random.normal(k_m, (co,), jnp.float32),
            var=jax.random.uniform(k_v, (co,), jnp.float32, 0.5, 1.5),
        ))
        last = co

    fwd = jax.jit(functools.partial(transition_down_forward,
                                    npoint=NPOINT, nsample=NSAMPLE))
    new_xyz, new_points = fwd(xyz, points, layer_params)
    jax.block_until_ready((new_xyz, new_points))

    # Correctness check against the pure-JAX reference.
    ref_xyz, ref_points = _reference_forward(xyz, points, layer_params,
                                             NPOINT, NSAMPLE)
    assert new_xyz.shape == (B, NPOINT, 3)
    assert new_points.shape == (B, NPOINT, CHANNELS[-1])
    assert jnp.allclose(new_xyz, ref_xyz, atol=1e-5, rtol=1e-5)
    assert jnp.allclose(new_points, ref_points, atol=1e-4, rtol=1e-4), (
        float(jnp.max(jnp.abs(new_points - ref_points))))

    print("KERNEL_OK")
</pallas_src>

<mosaic_0001>
module attributes {stable_mosaic.version = 11 : i64} {
  func.func @kernel(%arg0: i32, %arg1: i32, %arg2: memref<1x128x32xf32, #tpu.memory_space<vmem>>, %arg3: memref<32x64xf32, #tpu.memory_space<vmem>>, %arg4: memref<1x64xf32, #tpu.memory_space<vmem>>, %arg5: memref<64x128xf32, #tpu.memory_space<vmem>>, %arg6: memref<1x128xf32, #tpu.memory_space<vmem>>, %arg7: memref<1x16x128xf32, #tpu.memory_space<vmem>>) attributes {dimension_semantics = [#tpu.dimension_semantics<parallel>, #tpu.dimension_semantics<parallel>], iteration_bounds = array<i64: 2, 1>, scalar_prefetch = 0 : i64, scratch_operands = 0 : i64, tpu.core_type = #tpu.core_type<tc>, window_params = [{transform_indices = @transform_0, window_bounds = array<i64: 1, 128, 32>}, {pipeline_mode = #tpu.pipeline_mode<synchronous>, transform_indices = @transform_1, window_bounds = array<i64: 32, 64>}, {pipeline_mode = #tpu.pipeline_mode<synchronous>, transform_indices = @transform_2, window_bounds = array<i64: 1, 64>}, {pipeline_mode = #tpu.pipeline_mode<synchronous>, transform_indices = @transform_3, window_bounds = array<i64: 64, 128>}, {pipeline_mode = #tpu.pipeline_mode<synchronous>, transform_indices = @transform_4, window_bounds = array<i64: 1, 128>}, {transform_indices = @transform_5, window_bounds = array<i64: 1, 16, 128>}]} {
    %c0 = arith.constant 0 : index
    %c0_0 = arith.constant 0 : index
    %c0_1 = arith.constant 0 : index
    %0 = vector.load %arg2[%c0, %c0_0, %c0_1] : memref<1x128x32xf32, #tpu.memory_space<vmem>>, vector<1x128x32xf32>
    %1 = vector.shape_cast %0 : vector<1x128x32xf32> to vector<128x32xf32>
    %c0_2 = arith.constant 0 : index
    %c0_3 = arith.constant 0 : index
    %2 = vector.load %arg3[%c0_2, %c0_3] : memref<32x64xf32, #tpu.memory_space<vmem>>, vector<32x64xf32>
    %c0_4 = arith.constant 0 : index
    %c0_5 = arith.constant 0 : index
    %3 = vector.load %arg4[%c0_4, %c0_5] : memref<1x64xf32, #tpu.memory_space<vmem>>, vector<1x64xf32>
    %cst = arith.constant dense<0.000000e+00> : vector<128x64xf32>
    %4 = tpu.matmul %1, %2, %cst {dimension_numbers = #tpu.dot_dimension_numbers<[1], [0], [0], [1], [0, 0, 1, 1], [], []>} : vector<128x32xf32>, vector<32x64xf32>, vector<128x64xf32> -> vector<128x64xf32>
    %5 = vector.broadcast %3 : vector<1x64xf32> to vector<128x64xf32>
    %6 = arith.addf %4, %5 : vector<128x64xf32>
    %cst_6 = arith.constant 0.000000e+00 : f32
    %7 = vector.broadcast %cst_6 : f32 to vector<128x64xf32>
    %8 = arith.maximumf %6, %7 : vector<128x64xf32>
    %c0_7 = arith.constant 0 : index
    %c0_8 = arith.constant 0 : index
    %9 = vector.load %arg5[%c0_7, %c0_8] : memref<64x128xf32, #tpu.memory_space<vmem>>, vector<64x128xf32>
    %c0_9 = arith.constant 0 : index
    %c0_10 = arith.constant 0 : index
    %10 = vector.load %arg6[%c0_9, %c0_10] : memref<1x128xf32, #tpu.memory_space<vmem>>, vector<1x128xf32>
    %cst_11 = arith.constant dense<0.000000e+00> : vector<128x128xf32>
    %11 = tpu.matmul %8, %9, %cst_11 {dimension_numbers = #tpu.dot_dimension_numbers<[1], [0], [0], [1], [0, 0, 1, 1], [], []>} : vector<128x64xf32>, vector<64x128xf32>, vector<128x128xf32> -> vector<128x128xf32>
    %12 = vector.broadcast %10 : vector<1x128xf32> to vector<128x128xf32>
    %13 = arith.addf %11, %12 : vector<128x128xf32>
    %cst_12 = arith.constant 0.000000e+00 : f32
    %14 = vector.broadcast %cst_12 : f32 to vector<128x128xf32>
    %15 = arith.maximumf %13, %14 : vector<128x128xf32>
    %16 = vector.shape_cast %15 : vector<128x128xf32> to vector<16x8x128xf32>
    %cst_13 = arith.constant dense<0xFF800000> : vector<16x128xf32>
    %17 = vector.multi_reduction <maximumf>, %16, %cst_13 [1] : vector<16x8x128xf32> to vector<16x128xf32>
    %c0_14 = arith.constant 0 : index
    %c0_15 = arith.constant 0 : index
    %c0_16 = arith.constant 0 : index
    %18 = vector.load %arg7[%c0_14, %c0_15, %c0_16] : memref<1x16x128xf32, #tpu.memory_space<vmem>>, vector<1x16x128xf32>
    %19 = vector.shape_cast %18 : vector<1x16x128xf32> to vector<16x128xf32>
    %20 = vector.shape_cast %17 : vector<16x128xf32> to vector<1x16x128xf32>
    tpu.vector_store %arg7[%c0_14, %c0_15, %c0_16], %20 {strides = array<i32>} : memref<1x16x128xf32, #tpu.memory_space<vmem>>, vector<1x16x128xf32>,
    return
  }
  func.func @transform_0(%arg0: i32, %arg1: i32) -> (i32, i32, i32) {
    %c0_i32 = arith.constant 0 : i32
    %c0_i32_0 = arith.constant 0 : i32
    return %arg0, %arg1, %c0_i32 : i32, i32, i32
  }
  func.func @transform_1(%arg0: i32, %arg1: i32) -> (i32, i32) {
    %c0_i32 = arith.constant 0 : i32
    %c0_i32_0 = arith.constant 0 : i32
    %c0_i32_1 = arith.constant 0 : i32
    return %c0_i32, %c0_i32_0 : i32, i32
  }
  func.func @transform_2(%arg0: i32, %arg1: i32) -> (i32, i32) {
    %c0_i32 = arith.constant 0 : i32
    %c0_i32_0 = arith.constant 0 : i32
    %c0_i32_1 = arith.constant 0 : i32
    return %c0_i32, %c0_i32_0 : i32, i32
  }
  func.func @transform_3(%arg0: i32, %arg1: i32) -> (i32, i32) {
    %c0_i32 = arith.constant 0 : i32
    %c0_i32_0 = arith.constant 0 : i32
    %c0_i32_1 = arith.constant 0 : i32
    return %c0_i32, %c0_i32_0 : i32, i32
  }
  func.func @transform_4(%arg0: i32, %arg1: i32) -> (i32, i32) {
    %c0_i32 = arith.constant 0 : i32
    %c0_i32_0 = arith.constant 0 : i32
    %c0_i32_1 = arith.constant 0 : i32
    return %c0_i32, %c0_i32_0 : i32, i32
  }
  func.func @transform_5(%arg0: i32, %arg1: i32) -> (i32, i32, i32) {
    %c0_i32 = arith.constant 0 : i32
    %c0_i32_0 = arith.constant 0 : i32
    return %arg0, %arg1, %c0_i32 : i32, i32, i32
  }
}

</mosaic_0001>

<bundles_post_ra>
// kernel: custom-call.8
= control target key start
LH: loop header
LB: loop body
LE: loop exit
PB: predicated region body
PF: predicated region fallthrough
CT: control target
= control target key end

     0   :  { %s6_s0 = inlined_call_operand.vmem [shape: f32[2,64], index: 0, kind: output, shape index: {}]  }

// kernel: transition_down_forward.1
= control target key start
LH: loop header
LB: loop body
LE: loop exit
PB: predicated region body
PF: predicated region fallthrough
CT: control target
= control target key end

     0   :  { %10 = vsyncpa [#allocation3], 0  ;;  %s1563_s0 = inlined_call_operand.vmem [shape: f32[2,128,32], index: 0, kind: input, shape index: {}]   ;;  %s1564_s1 = inlined_call_operand.vmem [shape: f32[32,64], index: 1, kind: input, shape index: {}]   ;;  %s1565_s2 = inlined_call_operand.vmem [shape: f32[1,64], index: 2, kind: input, shape index: {}]   ;;  %s1566_s3 = inlined_call_operand.vmem [shape: f32[64,128], index: 3, kind: input, shape index: {}]   ;;  %s1567_s4 = inlined_call_operand.vmem [shape: f32[1,128], index: 4, kind: input, shape index: {}]   ;;  %s1568_s5 = inlined_call_operand.hbm [shape: f32[2,16,128], index: 5, kind: output, shape index: {}]  }
   0x1   :  { %12 = vsyncpa [#allocation3 + $0x1], 0  ;;  %s1315_s18 = smov 0   ;;  %s1317_s19 = smov 0  }
   0x2   :  { %s1319_s20 = smov 0   ;;  %s1321_s21 = smov 0  }
   0x3   :  { %s1323_s22 = smov 0   ;;  %s1325_s23 = smov 0  }
   0x4 LB: > { %s948_s24 = sadd.s32 4294967295, %s1280_s23   ;;  %s949_s25 = sadd.s32 4294967294, %s1280_s23   ;;  %s1280_s23 = sphi %s1325_s23, %s18_s23   ;;  %s1276_s22 = sphi %s1323_s22, %s1575_s22   ;;  %s1272_s21 = sphi %s1321_s21, %s1574_s21   ;;  %s1268_s20 = sphi %s1319_s20, %s1573_s20   ;;  %s1264_s19 = sphi %s1317_s19, %s1572_s19   ;;  %s1260_s18 = sphi %s1315_s18, %s1571_s18  }
   0x5   : > { %s30_s26 = sadd.s32 1, %s1276_s22  ;;  %s151_s27 = sadd.s32 1, %s1268_s20 }
   0x6   : > { %p32_p0 = scmp.ge.s32.totalorder %s30_s26, 2  ;;  %p161_p1 = scmp.ne.s32.totalorder %s1268_s20, %s1264_s19 }
   0x7   : > { %p162_p2 = scmp.eq.s32.totalorder %s948_s24, 1  ;;  %p167_p3 = scmp.ne.s32.totalorder %s1264_s19, %s1260_s18 }
   0x8   : > { %s1577_s26 = smov (%p32_p0, %s30_s26), 0  ;;  %p168_p5 = scmp.eq.s32.totalorder %s949_s25, 1 }
   0x9   : > { %p1355_p4 = por %p162_p2, %p161_p1  ;;  %s146_s29 = ssub.s32 %s1276_s22, %s1577_s26 }
   0xa   : > { %p952_p6 = scmp.ge.s32.totalorder %s1280_s23, 1  ;;  %p149_p7 = scmp.eq.s32.totalorder %s146_s29, 0 }
   0xb   : > { %p1362_p8 = por %p168_p5, %p167_p3  ;;  %p211_p9 = scmp.lt.s32.totalorder %s1280_s23, 3 }
   0xc   : > { %s1368_s6 = scalar_select %p149_p7, %s1268_s20, %s151_s27  }
   0xd   : > { %p212_p10 = pnand %p952_p6, %p211_p9 }
   0xe   : > { %v270_v0 = vld [vmem:[%s1564_s1] sm:$0xff] (!%p212_p10)  ;;  %v271_v1 = vld [vmem:[%s1564_s1 + $0x8] sm:$0xff] (!%p212_p10)  ;;  %v272_v2 = vld [vmem:[%s1564_s1 + $0x10] sm:$0xff] (!%p212_p10)  ;;  %p244_p11 = scmp.lt.s32.totalorder (!%p212_p10), %s1272_s21, 1  ;;  %vm281_vm0 = vcmask (!%p212_p10), 261120   ;;  %vm506_vm1 = vcmask (!%p212_p10), 523264  }
   0xf   : > { %215 = sbr.rel (%p212_p10) target bundleno = 522 (0x20a), region = 40  ;;  %v1113_v3 = vpack.c.bf16 (!%p212_p10), %v271_v1, %v270_v0  ;;  %v273_v4 = vld [vmem:[%s1564_s1 + $0x18] sm:$0xff] (!%p212_p10)  ;;  %v491_v5 = vld [vmem:[%s1566_s3] sm:$0xff] (!%p212_p10)  ;;  %v492_v6 = vld [vmem:[%s1566_s3 + $0x8] sm:$0xff] (!%p212_p10)  ;;  %vm828_vm2 = vcmask (!%p212_p10), 1041409   ;;  %vm830_vm3 = vcmask (!%p212_p10), 1042434  }
  0x10   : > { %v1117_v7 = vpack.c.bf16 (!%p212_p10), %v273_v4, %v272_v2  ;;  %v1121_v8 = vpack.c.bf16 (!%p212_p10), %v492_v6, %v491_v5  ;;  %v493_v9 = vld [vmem:[%s1566_s3 + $0x10] sm:$0xff] (!%p212_p10)  ;;  %v494_v10 = vld [vmem:[%s1566_s3 + $0x18] sm:$0xff] (!%p212_p10)  ;;  %v495_v12 = vld [vmem:[%s1566_s3 + $0x20] sm:$0xff] (!%p212_p10)  ;;  %vm832_vm4 = vcmask (!%p212_p10), 1043459   ;;  %vm834_vm5 = vcmask (!%p212_p10), 1044484   ;;  %s240_s10 = sand.u32 (!%p212_p10), 1, %s1264_s19  }
  0x11   : > { %1114 = vmatprep.subr.bf16.mxu0 (!%p212_p10), %v1113_v3  ;;  %v1125_v11 = vpack.c.bf16 (!%p212_p10), %v494_v10, %v493_v9  ;;  %v496_v13 = vld [vmem:[%s1566_s3 + $0x28] sm:$0xff] (!%p212_p10)  ;;  %v497_v31 = vld [vmem:[%s1566_s3 + $0x30] sm:$0xff] (!%p212_p10)  ;;  %v498_v32 = vld [vmem:[%s1566_s3 + $0x38] sm:$0xff] (!%p212_p10)  ;;  %vm836_vm6 = vcmask (!%p212_p10), 1045509   ;;  %vm838_vm7 = vcmask (!%p212_p10), 1046534   ;;  %vm840_vm8 = vcmask (!%p212_p10), 1047559  }
  0x12   : > { %1116 = vmatpush3.bf16.msra.mxu0 (!%p212_p10), %v1113_v3  ;;  %1137 = vmatprep.subr.bf16.mxu1 (!%p212_p10), %v1121_v8  ;;  %v1129_v16 = vpack.c.bf16 (!%p212_p10), %v496_v13, %v495_v12  ;;  %v1133_v33 = vpack.c.bf16 (!%p212_p10), %v498_v32, %v497_v31  ;;  %v956_v34 = vld [vmem:[%s1565_s2] ss:$0 sm:$0xff] (!%p212_p10)  ;;  %s953_s11 = sshll.u32 (!%p212_p10), %s240_s10, 4  ;;  %s996_s13 = sshll.u32 (!%p212_p10), %s1272_s21, 8 }
  0x13   : > { %1118 = vmatprep.subr.bf16.mxu0 (!%p212_p10), %v1117_v7  ;;  %1141 = vmatpush3.bf16.msra.mxu1 (!%p212_p10), %v1121_v8  ;;  %s1508_s17 = scalar_lea.hbm (!%p212_p10), %s1568_s5, %s996_s13 }
  0x14   : > { %1138 = vmatprep.subr.bf16.mxu1 (!%p212_p10), %v1125_v11 }
  0x16   : > { %s245_s25 = scalar_select %p244_p11, %s1272_s21, 1  ;;  %1120 = vmatpush3.bf16.msra.mxu0 %v1117_v7 }
  0x17   : > { %1122 = vmatprep.subr.bf16.mxu0 %v1121_v8  ;;  %1142 = vmatpush3.bf16.msra.mxu1 %v1125_v11  ;;  %s1517_s21 = scalar_lea.sflag [#allocation3], %s240_s10 }
  0x18   : > { %s995_s9 = sshll.u32 %s245_s25, 7  ;;  %1139 = vmatprep.subr.bf16.mxu1 %v1129_v16  ;;  %s1282_s25 = smov [#allocation2]  }
  0x19   : > { %s1399_s12 = scalar_lea.vmem %s1563_s0, %s995_s9  ;;  %s1206_s27 = sshll.u32 %s1282_s25, 4  ;;  %s1207_s27 = int_to_ptr.vmem [resolvable:$false] %s1206_s27 }
  0x1a   : > { %v254_v14 = vld [vmem:[%s1399_s12] sm:$0xff]  ;;  %v255_v15 = vld [vmem:[%s1399_s12 + $0x8] sm:$0xff]  ;;  %v256_v17 = vld [vmem:[%s1399_s12 + $0x10] sm:$0xff]  ;;  %s1208_s29 = scalar_lea.vmem %s1207_s27, 512 }
  0x1b   : > { %1049 = vmatprep.mubr.msk.f32.mxu0 %vm281_vm0, %v254_v14  ;;  %v257_v18 = vld [vmem:[%s1399_s12 + $0x18] sm:$0xff]  ;;  %v258_v19 = vld [vmem:[%s1399_s12 + $0x20] sm:$0xff]  ;;  %1143 = vmatpush3.bf16.msra.mxu1 %v1129_v16  ;;  %v259_v20 = vld [vmem:[%s1399_s12 + $0x28] sm:$0xff] }
  0x1c   : > { %1050 = vmatmul.mubr.msk.f32.vlgmr.msra.gmra.mrb[0].mxu0 %vm281_vm0, %v255_v15  ;;  %v260_v21 = vld [vmem:[%s1399_s12 + $0x30] sm:$0xff]  ;;  %v261_v22 = vld [vmem:[%s1399_s12 + $0x38] sm:$0xff]  ;;  %v262_v23 = vld [vmem:[%s1399_s12 + $0x40] sm:$0xff]  ;;  %1140 = vmatprep.subr.bf16.mxu1 %v1133_v33 }
  0x1d   : > { %1052 = vmatprep.mubr.msk.f32.mxu0 %vm281_vm0, %v256_v17  ;;  %1124 = vmatpush3.bf16.msra.mxu0 %v1121_v8  ;;  %v263_v24 = vld [vmem:[%s1399_s12 + $0x48] sm:$0xff]  ;;  %v264_v25 = vld [vmem:[%s1399_s12 + $0x50] sm:$0xff]  ;;  %v265_v26 = vld [vmem:[%s1399_s12 + $0x58] sm:$0xff] }
  0x1e   : > { %1126 = vmatprep.subr.bf16.mxu0 %v1125_v11  ;;  %v266_v27 = vld [vmem:[%s1399_s12 + $0x60] sm:$0xff]  ;;  %v267_v28 = vld [vmem:[%s1399_s12 + $0x68] sm:$0xff]  ;;  %v268_v29 = vld [vmem:[%s1399_s12 + $0x70] sm:$0xff] }
  0x1f   : > { %v269_v30 = vld [vmem:[%s1399_s12 + $0x78] sm:$0xff]  ;;  %1144 = vmatpush3.bf16.msra.mxu1 %v1133_v33  ;;  %s1495_s12 = scalar_lea.vmem [#allocation2], %s953_s11 }
  0x20   : > { %1053 = vmatmul.mubr.msk.f32.gmra.mrb[2].mxu0 %vm281_vm0, %v257_v18  ;;  %s869_s14 = sshll.u32 %s1495_s12, 4  ;;  %s1510_s14 = int_to_ptr.vmem [resolvable:$true] %s869_s14 }
  0x21   : > { %1055 = vmatprep.mubr.msk.f32.mxu0 %vm281_vm0, %v258_v19  ;;  %1128 = vmatpush3.bf16.msra.mxu0 %v1125_v11  ;;  %v1467_v19 = vld [vmem:[%s1567_s4] ss:$0 sm:$0xff]  ;;  %s1202_s24 = scalar_lea.vmem %s1510_s14, 256  ;;  %p1209_p1 = scmp.lt.s32.totalorder %s1510_s14, %s1207_s27 }
  0x22   : > { %1130 = vmatprep.subr.bf16.mxu0 %v1129_v16  ;;  %p1203_p12 = scmp.ne.s32.totalorder %s1510_s14, %s1202_s24  ;;  %p1210_p2 = scmp.lt.s32.totalorder %s1208_s29, %s1202_s24 }
  0x24   : > { %1056 = vmatmul.mubr.msk.f32.gmra.mrb[4].mxu0 %vm281_vm0, %v259_v20  ;;  %p1204_p13 = pnand %p1203_p12, %p1355_p4  ;;  %p1211_p3 = por %p1210_p2, %p1209_p1 }
  0x25   : > { %1058 = vmatprep.mubr.msk.f32.mxu0 %vm281_vm0, %v260_v21  ;;  %1132 = vmatpush3.bf16.msra.mxu0 %v1129_v16 }
  0x26   : > { %1134 = vmatprep.subr.bf16.mxu0 %v1133_v33  ;;  %p1205_p0 = pneg %p1204_p13 }
  0x28   : > { %1059 = vmatmul.mubr.msk.f32.gmra.mrb[6].mxu0 %vm281_vm0, %v261_v22  ;;  %p1212_p5 = pnand %p1211_p3, %p1205_p0 }
  0x29   : > { %1061 = vmatprep.mubr.msk.f32.mxu0 %vm281_vm0, %v262_v23  ;;  %1136 = vmatpush3.bf16.msra.mxu0 %v1133_v33 }
  0x2c   : > { %1062 = vmatmul.mubr.msk.f32.gmra.mrb[8].mxu0 %vm281_vm0, %v263_v24 }
  0x2d   : > { %1064 = vmatprep.mubr.msk.f32.mxu0 %vm281_vm0, %v264_v25 }
  0x30   : > { %1065 = vmatmul.mubr.msk.f32.gmra.mrb[10].mxu0 %vm281_vm0, %v265_v26 }
  0x31   : > { %1067 = vmatprep.mubr.msk.f32.mxu0 %vm281_vm0, %v266_v27 }
  0x34   : > { %1068 = vmatmul.mubr.msk.f32.gmra.mrb[12].mxu0 %vm281_vm0, %v267_v28 }
  0x35   : > { %1070 = vmatprep.mubr.msk.f32.mxu0 %vm281_vm0, %v268_v29 }
  0x38   : > { %1071 = vmatmul.mubr.msk.f32.gmra.mrb[14].mxu0 %vm281_vm0, %v269_v30 }
  0xef   : > { %v1051_v35 = vpop.f32.mrb[0].mxu0 }
  0xf0   : > { %v402_v36 = vadd.f32 %v1051_v35, %v956_v34  ;;  %v396_v37 = vpop.f32.mrb[1].mxu0 }
  0xf1   : > { %v397_v38 = vadd.f32 %v956_v34, %v396_v37 }
  0xf2   : > { %v476_v41 = vmax.f32 %v402_v36, 0.0 }
  0xf3   : > { %v475_v39 = vmax.f32 %v397_v38, 0.0  ;;  %v1054_v40 = vpop.f32.mrb[2].mxu0 }
  0xf4   : > { %v412_v42 = vadd.f32 %v1054_v40, %v956_v34  ;;  %v406_v43 = vpop.f32.mrb[3].mxu0 }
  0xf5   : > { %v407_v44 = vadd.f32 %v956_v34, %v406_v43  ;;  %1089 = vmatprep.mubr.msk.f32.mxu0 %vm506_vm1, %v475_v39 }
  0xf6   : > { %1090 = vmatmul.mubr.msk.f32.vlgmr.msra.gmra.mrb[16].mxu0 %vm506_vm1, %v476_v41  ;;  %v478_v47 = vmax.f32 %v412_v42, 0.0 }
  0xf7   : > { %v477_v45 = vmax.f32 %v407_v44, 0.0  ;;  %v1057_v46 = vpop.f32.mrb[4].mxu0 }
  0xf8   : > { %v422_v48 = vadd.f32 %v1057_v46, %v956_v34  ;;  %v416_v49 = vpop.f32.mrb[5].mxu0 }
  0xf9   : > { %v417_v50 = vadd.f32 %v956_v34, %v416_v49  ;;  %1092 = vmatprep.mubr.msk.f32.mxu1 %vm506_vm1, %v477_v45 }
  0xfa   : > { %1093 = vmatmul.mubr.msk.f32.vlgmr.msra.gmra.mrb[0].mxu1 %vm506_vm1, %v478_v47  ;;  %v480_v53 = vmax.f32 %v422_v48, 0.0 }
  0xfb   : > { %v479_v51 = vmax.f32 %v417_v50, 0.0  ;;  %v1060_v52 = vpop.f32.mrb[6].mxu0 }
  0xfc   : > { %v432_v54 = vadd.f32 %v1060_v52, %v956_v34  ;;  %v426_v55 = vpop.f32.mrb[7].mxu0 }
  0xfd   : > { %v427_v56 = vadd.f32 %v956_v34, %v426_v55  ;;  %1095 = vmatprep.mubr.msk.f32.mxu1 %vm506_vm1, %v479_v51 }
  0xfe   : > { %1096 = vmatmul.mubr.msk.f32.gmra.mrb[2].mxu1 %vm506_vm1, %v480_v53  ;;  %v482_v59 = vmax.f32 %v432_v54, 0.0 }
  0xff   : > { %v481_v57 = vmax.f32 %v427_v56, 0.0  ;;  %v1063_v58 = vpop.f32.mrb[8].mxu0 }
 0x100   : > { %v442_v60 = vadd.f32 %v1063_v58, %v956_v34  ;;  %v436_v61 = vpop.f32.mrb[9].mxu0 }
 0x101   : > { %v437_v62 = vadd.f32 %v956_v34, %v436_v61  ;;  %1098 = vmatprep.mubr.msk.f32.mxu1 %vm506_vm1, %v481_v57 }
 0x102   : > { %1099 = vmatmul.mubr.msk.f32.gmra.mrb[4].mxu1 %vm506_vm1, %v482_v59  ;;  %v484_v1 = vmax.f32 %v442_v60, 0.0 }
 0x103   : > { %v483_v63 = vmax.f32 %v437_v62, 0.0  ;;  %v1066_v0 = vpop.f32.mrb[10].mxu0 }
 0x104   : > { %v452_v2 = vadd.f32 %v1066_v0, %v956_v34  ;;  %v446_v3 = vpop.f32.mrb[11].mxu0 }
 0x105   : > { %v447_v4 = vadd.f32 %v956_v34, %v446_v3  ;;  %1101 = vmatprep.mubr.msk.f32.mxu1 %vm506_vm1, %v483_v63 }
 0x106   : > { %1102 = vmatmul.mubr.msk.f32.gmra.mrb[6].mxu1 %vm506_vm1, %v484_v1  ;;  %v486_v7 = vmax.f32 %v452_v2, 0.0 }
 0x107   : > { %v485_v5 = vmax.f32 %v447_v4, 0.0  ;;  %v1069_v6 = vpop.f32.mrb[12].mxu0 }
 0x108   : > { %v462_v8 = vadd.f32 %v1069_v6, %v956_v34  ;;  %v456_v9 = vpop.f32.mrb[13].mxu0 }
 0x109   : > { %v457_v10 = vadd.f32 %v956_v34, %v456_v9  ;;  %1104 = vmatprep.mubr.msk.f32.mxu1 %vm506_vm1, %v485_v5 }
 0x10a   : > { %1105 = vmatmul.mubr.msk.f32.gmra.mrb[8].mxu1 %vm506_vm1, %v486_v7  ;;  %v488_v13 = vmax.f32 %v462_v8, 0.0 }
 0x10b   : > { %v487_v11 = vmax.f32 %v457_v10, 0.0  ;;  %v1072_v12 = vpop.f32.mrb[14].mxu0 }
 0x10c   : > { %v472_v14 = vadd.f32 %v1072_v12, %v956_v34  ;;  %v466_v15 = vpop.f32.mrb[15].mxu0 }
 0x10d   : > { %v467_v16 = vadd.f32 %v956_v34, %v466_v15  ;;  %1107 = vmatprep.mubr.msk.f32.mxu1 %vm506_vm1, %v487_v11 }
 0x10e   : > { %1108 = vmatmul.mubr.msk.f32.gmra.mrb[10].mxu1 %vm506_vm1, %v488_v13  ;;  %v490_v18 = vmax.f32 %v472_v14, 0.0 }
 0x10f   : > { %v489_v17 = vmax.f32 %v467_v16, 0.0 }
 0x111   : > { %1110 = vmatprep.mubr.msk.f32.mxu1 %vm506_vm1, %v489_v17 }
 0x112   : > { %1111 = vmatmul.mubr.msk.f32.gmra.mrb[12].mxu1 %vm506_vm1, %v490_v18 }
 0x1c9   : > { %v1091_v20 = vpop.f32.mrb[16].mxu0 }
 0x1ca   : > { %v627_v21 = vadd.f32 %v1091_v20, %v1467_v19  ;;  %v621_v22 = vpop.f32.mrb[17].mxu0 }
 0x1cb   : > { %v622_v23 = vadd.f32 %v1467_v19, %v621_v22 }
 0x1cc   : > { %v701_v24 = vmax.f32 %v627_v21, 0.0 }
 0x1cd   : > { %v700_v25 = vmax.f32 %v622_v23, 0.0  ;;  %v1094_v26 = vpop.f32.mrb[0].mxu1 }
 0x1ce   : > { %v722_v27 = vrot.slane %v701_v24, 4  ;;  %v637_v28 = vadd.f32 %v1094_v26, %v1467_v19  ;;  %v631_v29 = vpop.f32.mrb[1].mxu1 }
 0x1cf   : > { %v716_v30 = vrot.slane %v700_v25, 4  ;;  %v632_v31 = vadd.f32 %v1467_v19, %v631_v29 }
 0x1d0   : > { %v723_v32 = vmax.f32 %v701_v24, %v722_v27  ;;  %v703_v33 = vmax.f32 %v637_v28, 0.0 }
 0x1d1   : > { %v717_v34 = vmax.f32 %v700_v25, %v716_v30  ;;  %v702_v35 = vmax.f32 %v632_v31, 0.0  ;;  %v1097_v36 = vpop.f32.mrb[2].mxu1 }
 0x1d2   : > { %v724_v37 = vrot.slane %v723_v32, 2  ;;  %v734_v38 = vrot.slane %v703_v33, 4  ;;  %v647_v39 = vadd.f32 %v1097_v36, %v1467_v19  ;;  %v641_v40 = vpop.f32.mrb[3].mxu1 }
 0x1d3   : > { %v718_v41 = vrot.slane %v717_v34, 2  ;;  %v728_v42 = vrot.slane %v702_v35, 4  ;;  %v642_v43 = vadd.f32 %v1467_v19, %v641_v40 }
 0x1d4   : > { %v725_v44 = vmax.f32 %v723_v32, %v724_v37  ;;  %v735_v45 = vmax.f32 %v703_v33, %v734_v38  ;;  %v705_v46 = vmax.f32 %v647_v39, 0.0 }
 0x1d5   : > { %v719_v47 = vmax.f32 %v717_v34, %v718_v41  ;;  %v729_v48 = vmax.f32 %v702_v35, %v728_v42  ;;  %v704_v49 = vmax.f32 %v642_v43, 0.0  ;;  %v1100_v50 = vpop.f32.mrb[4].mxu1 }
 0x1d6   : > { %v726_v51 = vrot.slane %v725_v44, 1  ;;  %v736_v52 = vrot.slane %v735_v45, 2  ;;  %v746_v53 = vrot.slane %v705_v46, 4  ;;  %v657_v54 = vadd.f32 %v1100_v50, %v1467_v19  ;;  %v651_v55 = vpop.f32.mrb[5].mxu1 }
 0x1d7   : > { %v720_v56 = vrot.slane %v719_v47, 1  ;;  %v730_v57 = vrot.slane %v729_v48, 2  ;;  %v740_v58 = vrot.slane %v704_v49, 4  ;;  %v652_v59 = vadd.f32 %v1467_v19, %v651_v55 }
 0x1d8   : > { %v727_v60 = vmax.f32 %v725_v44, %v726_v51  ;;  %v737_v61 = vmax.f32 %v735_v45, %v736_v52  ;;  %v747_v62 = vmax.f32 %v705_v46, %v746_v53  ;;  %v707_v63 = vmax.f32 %v657_v54, 0.0 }
 0x1d9   : > { %v721_v0 = vmax.f32 %v719_v47, %v720_v56  ;;  %v731_v1 = vmax.f32 %v729_v48, %v730_v57  ;;  %v741_v2 = vmax.f32 %v704_v49, %v740_v58  ;;  %v706_v3 = vmax.f32 %v652_v59, 0.0  ;;  %v1103_v4 = vpop.f32.mrb[6].mxu1 }
 0x1da   : > { %v738_v5 = vrot.slane %v737_v61, 1  ;;  %v748_v6 = vrot.slane %v747_v62, 2  ;;  %v758_v7 = vrot.slane %v707_v63, 4  ;;  %v667_v8 = vadd.f32 %v1103_v4, %v1467_v19  ;;  %v661_v9 = vpop.f32.mrb[7].mxu1 }
 0x1db   : > { %v829_v10 = vsel %vm828_vm2, %v727_v60, %v721_v0  ;;  %v732_v11 = vrot.slane %v731_v1, 1  ;;  %v742_v12 = vrot.slane %v741_v2, 2  ;;  %v752_v13 = vrot.slane %v706_v3, 4 }
 0x1dc   : > { %v739_v14 = vmax.f32 %v737_v61, %v738_v5  ;;  %v749_v15 = vmax.f32 %v747_v62, %v748_v6  ;;  %v759_v16 = vmax.f32 %v707_v63, %v758_v7  ;;  %v709_v17 = vmax.f32 %v667_v8, 0.0 }
 0x1dd   : > { %v733_v18 = vmax.f32 %v731_v1, %v732_v11  ;;  %v743_v20 = vmax.f32 %v741_v2, %v742_v12  ;;  %v753_v21 = vmax.f32 %v706_v3, %v752_v13  ;;  %v662_v22 = vadd.f32 %v1467_v19, %v661_v9  ;;  %v1106_v23 = vpop.f32.mrb[8].mxu1 }
 0x1de   : > { %v750_v24 = vrot.slane %v749_v15, 1  ;;  %v760_v25 = vrot.slane %v759_v16, 2  ;;  %v770_v26 = vrot.slane %v709_v17, 4  ;;  %v677_v27 = vadd.f32 %v1106_v23, %v1467_v19  ;;  %v671_v28 = vpop.f32.mrb[9].mxu1 }
 0x1df   : > { %v831_v29 = vsel %vm830_vm3, %v733_v18, %v829_v10  ;;  %v744_v30 = vrot.slane %v743_v20, 1  ;;  %v754_v31 = vrot.slane %v753_v21, 2  ;;  %v708_v32 = vmax.f32 %v662_v22, 0.0 }
 0x1e0   : > { %v751_v33 = vmax.f32 %v749_v15, %v750_v24  ;;  %v833_v34 = vsel %vm832_vm4, %v739_v14, %v831_v29  ;;  %v761_v35 = vmax.f32 %v759_v16, %v760_v25  ;;  %v771_v36 = vmax.f32 %v709_v17, %v770_v26 }
 0x1e1   : > { %v745_v37 = vmax.f32 %v743_v20, %v744_v30  ;;  %v755_v38 = vmax.f32 %v753_v21, %v754_v31  ;;  %v764_v39 = vrot.slane %v708_v32, 4  ;;  %v711_v40 = vmax.f32 %v677_v27, 0.0  ;;  %v1109_v41 = vpop.f32.mrb[10].mxu1 }
 0x1e2   : > { %v762_v42 = vrot.slane %v761_v35, 1  ;;  %v772_v43 = vrot.slane %v771_v36, 2  ;;  %v672_v44 = vadd.f32 %v1467_v19, %v671_v28  ;;  %v687_v45 = vadd.f32 %v1109_v41, %v1467_v19  ;;  %v681_v46 = vpop.f32.mrb[11].mxu1 }
 0x1e3   : > { %v835_v47 = vsel %vm834_vm5, %v745_v37, %v833_v34  ;;  %v756_v48 = vrot.slane %v755_v38, 1  ;;  %v765_v49 = vmax.f32 %v708_v32, %v764_v39  ;;  %v782_v50 = vrot.slane %v711_v40, 4 }
 0x1e4   : > { %v763_v51 = vmax.f32 %v761_v35, %v762_v42  ;;  %v837_v52 = vsel %vm836_vm6, %v751_v33, %v835_v47  ;;  %v773_v53 = vmax.f32 %v771_v36, %v772_v43  ;;  %v710_v54 = vmax.f32 %v672_v44, 0.0 }
 0x1e5   : > { %v757_v55 = vmax.f32 %v755_v38, %v756_v48  ;;  %v766_v56 = vrot.slane %v765_v49, 2  ;;  %v783_v57 = vmax.f32 %v711_v40, %v782_v50  ;;  %v713_v58 = vmax.f32 %v687_v45, 0.0  ;;  %v1112_v59 = vpop.f32.mrb[12].mxu1 }
 0x1e6   : > { %v774_v60 = vrot.slane %v773_v53, 1  ;;  %v776_v61 = vrot.slane %v710_v54, 4  ;;  %v682_v62 = vadd.f32 %v1467_v19, %v681_v46  ;;  %v697_v63 = vadd.f32 %v1112_v59, %v1467_v19  ;;  %v691_v0 = vpop.f32.mrb[13].mxu1 }
 0x1e7   : > { %v839_v1 = vsel %vm838_vm7, %v757_v55, %v837_v52  ;;  %v767_v2 = vmax.f32 %v765_v49, %v766_v56  ;;  %v784_v3 = vrot.slane %v783_v57, 2  ;;  %v794_v4 = vrot.slane %v713_v58, 4 }
 0x1e8   : > { %v775_v5 = vmax.f32 %v773_v53, %v774_v60  ;;  %v777_v6 = vmax.f32 %v710_v54, %v776_v61  ;;  %v712_v7 = vmax.f32 %v682_v62, 0.0  ;;  %v715_v8 = vmax.f32 %v697_v63, 0.0 }
 0x1e9   : > { %v768_v9 = vrot.slane %v767_v2, 1  ;;  %v785_v10 = vmax.f32 %v783_v57, %v784_v3  ;;  %v795_v11 = vmax.f32 %v713_v58, %v794_v4  ;;  %v692_v12 = vadd.f32 %v1467_v19, %v691_v0 }
 0x1ea   : > { %v778_v13 = vrot.slane %v777_v6, 2  ;;  %v788_v14 = vrot.slane %v712_v7, 4  ;;  %v806_v15 = vrot.slane %v715_v8, 4  ;;  %v841_v16 = vsel %vm840_vm8, %v763_v51, %v839_v1 }
 0x1eb   : > { %v769_v17 = vmax.f32 %v767_v2, %v768_v9  ;;  %v796_v18 = vrot.slane %v795_v11, 2  ;;  %v714_v20 = vmax.f32 %v692_v12, 0.0  ;;  %851 = vst [vmem:[%s1495_s12] sm:$0xff] %v841_v16  ;;  %v786_v25 = vrot.slane %v785_v10, 1 }
 0x1ec   : > { %v779_v21 = vmax.f32 %v777_v6, %v778_v13  ;;  %v789_v22 = vmax.f32 %v712_v7, %v788_v14  ;;  %v807_v23 = vmax.f32 %v715_v8, %v806_v15 }
 0x1ed   : > { %v842_v24 = vsel %vm828_vm2, %v775_v5, %v769_v17  ;;  %v797_v26 = vmax.f32 %v795_v11, %v796_v18  ;;  %v800_v19 = vrot.slane %v714_v20, 4  ;;  %v787_v34 = vmax.f32 %v785_v10, %v786_v25 }
 0x1ee   : > { %v780_v27 = vrot.slane %v779_v21, 1  ;;  %v790_v28 = vrot.slane %v789_v22, 2  ;;  %v808_v29 = vrot.slane %v807_v23, 2 }
 0x1ef   : > { %v801_v30 = vmax.f32 %v714_v20, %v800_v19  ;;  %v798_v35 = vrot.slane %v797_v26, 1 }
 0x1f0   : > { %v781_v31 = vmax.f32 %v779_v21, %v780_v27  ;;  %v791_v32 = vmax.f32 %v789_v22, %v790_v28  ;;  %v809_v33 = vmax.f32 %v807_v23, %v808_v29 }
 0x1f1   : > { %v802_v36 = vrot.slane %v801_v30, 2  ;;  %v799_v43 = vmax.f32 %v797_v26, %v798_v35 }
 0x1f2   : > { %v843_v37 = vsel %vm830_vm3, %v781_v31, %v842_v24  ;;  %v792_v38 = vrot.slane %v791_v32, 1  ;;  %v810_v42 = vrot.slane %v809_v33, 1 }
 0x1f3   : > { %v844_v39 = vsel %vm832_vm4, %v787_v34, %v843_v37  ;;  %v803_v40 = vmax.f32 %v801_v30, %v802_v36 }
 0x1f4   : > { %v793_v41 = vmax.f32 %v791_v32, %v792_v38  ;;  %v811_v48 = vmax.f32 %v809_v33, %v810_v42 }
 0x1f5   : > { %v804_v44 = vrot.slane %v803_v40, 1 }
 0x1f6   : > { %v845_v45 = vsel %vm834_vm5, %v793_v41, %v844_v39 }
 0x1f7   : > { %v805_v46 = vmax.f32 %v803_v40, %v804_v44  ;;  %v846_v47 = vsel %vm836_vm6, %v799_v43, %v845_v45 }
 0x1f9   : > { %v847_v49 = vsel %vm838_vm7, %v805_v46, %v846_v47 }
 0x1fa   : > { %v848_v50 = vsel %vm840_vm8, %v811_v48, %v847_v49 }
 0x1fb   : > { %852 = vst [vmem:[%s1495_s12 + $0x8] sm:$0xff] %v848_v50 }
 0x1fc   : > { %1215 = shalt.err (!%p1212_p5)
}
 0x1fd   : > { %s1216_s7 = scalar_lea.hbm %s1508_s17, 256  ;;  %s1220_s10 = scalar_lea.hbm %s1568_s5, 512 }
 0x1fe   : > { %p1217_p6 = scmp.ne.s32.totalorder %s1508_s17, %s1216_s7  ;;  %p1221_p10 = scmp.lt.u32.totalorder %s1508_s17, %s1568_s5 }
 0x1ff   : > { %p1222_p11 = scmp.lt.u32.totalorder %s1220_s10, %s1216_s7  ;;  %p1224_p13 = scmp.lt.u32.totalorder %s1216_s7, %s1508_s17 }
 0x200   : > { %p1218_p7 = pnand %p1217_p6, %p1355_p4 }
 0x201   : > { %p1223_p12 = por %p1222_p11, %p1221_p10 }
 0x202   : > { %p1219_p9 = pneg %p1218_p7 }
 0x203   : > { %p1225_p0 = por %p1224_p13, %p1223_p12 }
 0x205   : > { %p1226_p1 = pnand %p1225_p0, %p1219_p9 }
 0x207   : > { %1229 = shalt.err (!%p1226_p1)
}
 0x208   : > { %s1283_s13 = smov 128   ;;  %s1284_s15 = smov 8  }
 0x209   : > { %1145 = dma.vmem_to_hbm [thread:$0]  (%p1355_p4), %s1510_s14, 256, %s1508_s17, %s1517_s21, %s1283_s13, %s1283_s13, %s1284_s15  }
 0x20a PF: > { %p1151_p2 = scmp.ge.s32.totalorder %s1280_s23, 2  ;;  %s884_s16 = sand.u32 1, %s1260_s18  }
 0x20b   : > { %s885_s24 = scalar_lea.sflag [#allocation3], %s884_s16 }
 0x20c   : > { %p1148_p3 = pnand %p1151_p2, %p1362_p8 }
 0x20e   : > { %1255 = dma.done.wait (!%p1148_p3), %s885_s24, 256  }
 0x20f   : > { %1257 = vsyncadd (!%p1148_p3), %s885_s24, 4294967040  ;;  %s18_s23 = sadd.s32 1, %s1280_s23   ;;  %s1571_s18 = smov %s1264_s19 }
 0x210   : > { %p15_p5 = scmp.ge.s32.totalorder %s18_s23, 4   ;;  %s1572_s19 = smov %s1268_s20 }
 0x211   : > { %s1573_s20 = smov %s1368_s6  ;;  %s1574_s21 = smov %s1276_s22 }
 0x212   : > { %s1575_s22 = smov %s1577_s26  ;;  %17 = sbr.rel (!%p15_p5) target bundleno = 4 (0x4), region = 75 }
 0x219   :  { %890 = vsyncpa [#allocation3], 1 }
 0x21a   :  { %892 = vsyncpa [#allocation3 + $0x1], 1 }

</bundles_post_ra>
